<compile_context>
chip_gen: v7x
topology: tpu7x:2x2x1
jax: 0.10.0
libtpu: 0.0.40
codegen_flags: <defaults>
</compile_context>

<pallas_src>
import collections.abc
import warnings

import jax
import jax.numpy as jnp
from jax.experimental import pallas as pl
from jax.experimental.pallas import tpu as pltpu


# ----------------------------- Pallas kernel ------------------------------ #

def _scores_kernel(x_ref, w_ref, b_ref, o_ref):
    """One resident (tm, tn) f32 output tile; K is the innermost grid axis."""
    k = pl.program_id(2)

    @pl.when(k == 0)
    def _():
        # Seed the resident accumulator (== output tile) with the bias row.
        o_ref[...] = jnp.broadcast_to(b_ref[...], o_ref.shape)

    # bf16 x bf16 -> f32 accumulate on the MXU (x is cast in-kernel on the VPU;
    # W already lives in bf16 in HBM).
    o_ref[...] += jnp.dot(x_ref[...].astype(jnp.bfloat16), w_ref[...],
                          preferred_element_type=jnp.float32)


def _round_up(x, m):
    return (x + m - 1) // m * m


def prepare_scores_params(w, b, *, tn=256, tk=512):
    """Build-time (one-off) cast + pad of W / b to tile multiples.

    w: (H, C) f32, b: (C,) f32 -> dict with bf16 W (Hp, Cp), f32 bias (1, Cp),
    the logical class count and the N/K tile sizes the padding was done for.
    """
    H, C = w.shape
    # N/K tiles: 256-aligned by default (full occupancy on v6e/v7x 256x256
    # MXUs, still optimal 128-multiples on v5e), clamped to the padded dims.
    tn = min(tn, _round_up(C, 128))
    tk = min(tk, _round_up(H, 128))
    Hp, Cp = _round_up(H, tk), _round_up(C, tn)
    wb = jnp.pad(w.astype(jnp.bfloat16), ((0, Hp - H), (0, Cp - C)))
    bb = jnp.pad(b.astype(jnp.float32).reshape(1, C), ((0, 0), (0, Cp - C)))
    return {"w": wb, "b": bb, "num_classes": C, "tn": tn, "tk": tk}


def pallas_scores(x, params, *, tm=256, w_buffers=2):
    """scores = x @ W + b with a tiled Pallas TPU kernel.

    x: (B, H) float32, params from prepare_scores_params -> (B, C) float32.
    Matmul runs in bf16 on the MXU with f32 accumulation; bias add is f32.
    """
    B, H = x.shape
    wb, bb = params["w"], params["b"]
    Hp, Cp = wb.shape
    C, tn, tk = params["num_classes"], params["tn"], params["tk"]
    assert H <= Hp and Hp % tk == 0 and Cp % tn == 0, "params/tile mismatch"

    # Batch tile: pad only to the bf16 sublane pack (16 rows), not a full
    # 128-row MXU tile, so tiny inference batches don't do 16x wasted work.
    tm = min(tm, _round_up(B, 16))
    Bp = _round_up(B, tm)
    if (Bp, Hp) != (B, H):
        x = jnp.pad(x, ((0, Bp - B), (0, Hp - H)))

    grid = (Bp // tm, Cp // tn, Hp // tk)
    # NOTE: on v7x both TensorCores are only busy if a "parallel" axis has
    # extent >= 2; for tiny demo shapes the grid may be (1, j, k) and that is
    # accepted (the fixed pallas_call overhead dominates anyway).

    # Optional deeper pipelining of the W stream (the dominant HBM stream for
    # skinny M).  Default 2 keeps the standard double buffer.
    w_spec_kwargs = {}
    if w_buffers != 2:
        w_spec_kwargs["pipeline_mode"] = pl.Buffered(w_buffers)

    # VMEM working set for this tile config -> explicit vmem_limit_bytes.
    working = (2 * tm * tk * 4                       # x tiles (f32, cast in-kernel)
               + max(2, w_buffers) * tk * tn * 2     # W tiles (bf16)
               + 2 * tn * 4                          # bias tiles
               + 2 * tm * tn * 4)                    # resident/writeback out tiles
    vmem_limit = min(_round_up(working, 1 << 20) + (8 << 20), 48 << 20)

    out = pl.pallas_call(
        _scores_kernel,
        out_shape=jax.ShapeDtypeStruct((Bp, Cp), jnp.float32),
        grid=grid,
        in_specs=[
            pl.BlockSpec((tm, tk), lambda i, j, k: (i, k)),                    # x
            pl.BlockSpec((tk, tn), lambda i, j, k: (k, j), **w_spec_kwargs),   # W
            pl.BlockSpec((1, tn), lambda i, j, k: (0, j)),                     # bias
        ],
        out_specs=pl.BlockSpec((tm, tn), lambda i, j, k: (i, j)),
        compiler_params=pltpu.CompilerParams(
            # B / C axes parallel (2 TCs on v7x), K reduction arbitrary.
            dimension_semantics=("parallel", "parallel", "arbitrary"),
            vmem_limit_bytes=vmem_limit,
        ),
        cost_estimate=pl.CostEstimate(
            flops=2 * Bp * Hp * Cp,
            transcendentals=0,
            bytes_accessed=((Cp // tn) * Bp * Hp * 4     # x re-read per N block
                            + (Bp // tm) * Hp * Cp * 2   # W re-read per M block
                            + (Bp // tm) * Cp * 4        # bias
                            + Bp * Cp * 4),              # output writeback
        ),
    )(x, wb, bb)

    if (Bp, Cp) != (B, C):
        out = out[:B, :C]
    return out


# --------------------------- BaseModel analogue ---------------------------- #

class BaseModelJAX:
    """JAX/Pallas analogue of Pythia's BaseModel.

    Reproduces the __call__ contract: forward returns a Mapping containing
    "scores"; __call__ asserts this and attaches "losses" / "metrics" dicts
    (empty here since the synthetic config defines none).
    """

    def __init__(self, config):
        self.config = config
        # TODO(synk): registry.get('writer') has no JAX/Pallas equivalent.
        self.writer = None
        self._params_raw = None
        self._scores_params = None

    def build(self):
        """Deterministic parameter init (stands in for child-model build).

        Weights are cast to bf16 and padded to tile multiples HERE, once,
        so the per-call forward does no wrapper-side casts/pads over W.
        """
        hidden = self.config["hidden_dim"]
        num_classes = self.config["num_classes"]
        kw, kb = jax.random.split(jax.random.PRNGKey(42))
        w = jax.random.normal(kw, (hidden, num_classes), jnp.float32) * 0.02
        b = jax.random.normal(kb, (num_classes,), jnp.float32) * 0.02
        self._params_raw = {"w": w, "b": b}
        self._scores_params = prepare_scores_params(
            w, b,
            tn=self.config.get("tile_n", 256),
            tk=self.config.get("tile_k", 512),
        )

    def init_losses_and_metrics(self):
        losses = self.config.get("losses", [])
        metrics = self.config.get("metrics", [])
        if len(losses) == 0:
            warnings.warn(
                "No losses are defined in model configuration. You are "
                "expected to return loss in your return dict from forward."
            )
        if len(metrics) == 0:
            warnings.warn(
                "No metrics are defined in model configuration. You are "
                "expected to return metrics in your return dict from forward."
            )
        # TODO(synk): Pythia Losses/Metrics containers not translatable; use dicts.
        self.losses = lambda sample_list, model_output: {}
        self.metrics = lambda sample_list, model_output, *a, **kw: {}

    def forward(self, sample_list, *args, **kwargs):
        # Concrete child-style forward: scores head over pooled features,
        # computed inside the tiled Pallas kernel.
        x = sample_list["features"]                     # (B, H) float32
        scores = pallas_scores(x, self._scores_params,
                               tm=self.config.get("tile_m", 256))
        return {"scores": scores}

    def __call__(self, sample_list, model_llama2=None, question_str=None,
                 ocr_tokens=None, *args, **kwargs):
        model_output = self.forward(sample_list, *args, **kwargs)
        assert isinstance(model_output, collections.abc.Mapping), \
            "A dict must be returned from the forward of the model."
        if "losses" in model_output:
            warnings.warn("'losses' already present in model output. "
                          "No calculation will be done in base model.")
            assert isinstance(model_output["losses"], collections.abc.Mapping)
        else:
            model_output["losses"] = self.losses(sample_list, model_output)
        if "metrics" in model_output:
            warnings.warn("'metrics' already present in model output. "
                          "No calculation will be done in base model.")
            assert isinstance(model_output["metrics"], collections.abc.Mapping)
        else:
            model_output["metrics"] = self.metrics(
                sample_list, model_output, model_llama2, question_str, ocr_tokens
            )
        return model_output


# --------------------------------- main ------------------------------------ #

if __name__ == "__main__":
    # Small demo shapes that still exercise a multi-block grid:
    #   B=8  -> M padded only to 16 rows (not 128),
    #   H=512, tile_k=256 -> 2-step K accumulation,
    #   C=384, tile_n=256 -> 2 N blocks, C padded 384 -> 512 and sliced back.
    B, H, C = 8, 512, 384

    config = {"hidden_dim": H, "num_classes": C, "losses": [], "metrics": [],
              "tile_n": 256, "tile_k": 256, "tile_m": 256}
    model = BaseModelJAX(config)
    model.build()
    with warnings.catch_warnings():
        warnings.simplefilter("ignore")
        model.init_losses_and_metrics()

    key = jax.random.PRNGKey(0)
    features = jax.random.normal(key, (B, H), jnp.float32)
    sample_list = {"features": features}

    out = model(sample_list)
    scores = jax.block_until_ready(out["scores"])

    # Sanity check against a plain-JAX reference using the same bf16 matmul
    # precision (MXU) with f32 accumulation and f32 bias add.
    ref = jnp.dot(features.astype(jnp.bfloat16),
                  model._params_raw["w"].astype(jnp.bfloat16),
                  preferred_element_type=jnp.float32) + model._params_raw["b"]
    assert scores.shape == (B, C)
    assert isinstance(out["losses"], collections.abc.Mapping)
    assert isinstance(out["metrics"], collections.abc.Mapping)
    assert jnp.allclose(scores, ref, atol=1e-3, rtol=1e-3)

    print("KERNEL_OK")
</pallas_src>

<mosaic_0001>
module attributes {stable_mosaic.version = 11 : i64} {
  func.func @_scores_kernel(%arg0: i32, %arg1: i32, %arg2: i32, %arg3: memref<16x256xf32, #tpu.memory_space<vmem>>, %arg4: memref<256x256xbf16, #tpu.memory_space<vmem>>, %arg5: memref<1x256xf32, #tpu.memory_space<vmem>>, %arg6: memref<16x256xf32, #tpu.memory_space<vmem>>) attributes {dimension_semantics = [#tpu.dimension_semantics<parallel>, #tpu.dimension_semantics<parallel>, #tpu.dimension_semantics<arbitrary>], iteration_bounds = array<i64: 1, 2, 2>, scalar_prefetch = 0 : i64, scratch_operands = 0 : i64, tpu.core_type = #tpu.core_type<tc>, window_params = [{transform_indices = @transform_0, window_bounds = array<i64: 16, 256>}, {transform_indices = @transform_1, window_bounds = array<i64: 256, 256>}, {transform_indices = @transform_2, window_bounds = array<i64: 1, 256>}, {transform_indices = @transform_3, window_bounds = array<i64: 16, 256>}]} {
    %c0_i32 = arith.constant 0 : i32
    %0 = arith.cmpi eq, %arg2, %c0_i32 : i32
    %1 = arith.extui %0 : i1 to i32
    %c0_i32_0 = arith.constant 0 : i32
    %2 = arith.cmpi ne, %1, %c0_i32_0 : i32
    scf.if %2 {
      %c0_8 = arith.constant 0 : index
      %c0_9 = arith.constant 0 : index
      %10 = vector.load %arg5[%c0_8, %c0_9] : memref<1x256xf32, #tpu.memory_space<vmem>>, vector<1x256xf32>
      %11 = vector.shape_cast %10 : vector<1x256xf32> to vector<1x256xf32>
      %12 = vector.broadcast %11 : vector<1x256xf32> to vector<16x256xf32>
      %c0_10 = arith.constant 0 : index
      %c0_11 = arith.constant 0 : index
      %13 = vector.load %arg6[%c0_10, %c0_11] : memref<16x256xf32, #tpu.memory_space<vmem>>, vector<16x256xf32>
      tpu.vector_store %arg6[%c0_10, %c0_11], %12 {strides = array<i32>} : memref<16x256xf32, #tpu.memory_space<vmem>>, vector<16x256xf32>,
    } else {
    }
    %c0 = arith.constant 0 : index
    %c0_1 = arith.constant 0 : index
    %3 = vector.load %arg6[%c0, %c0_1] : memref<16x256xf32, #tpu.memory_space<vmem>>, vector<16x256xf32>
    %c0_2 = arith.constant 0 : index
    %c0_3 = arith.constant 0 : index
    %4 = vector.load %arg3[%c0_2, %c0_3] : memref<16x256xf32, #tpu.memory_space<vmem>>, vector<16x256xf32>
    %5 = arith.truncf %4 : vector<16x256xf32> to vector<16x256xbf16>
    %c0_4 = arith.constant 0 : index
    %c0_5 = arith.constant 0 : index
    %6 = vector.load %arg4[%c0_4, %c0_5] : memref<256x256xbf16, #tpu.memory_space<vmem>>, vector<256x256xbf16>
    %cst = arith.constant dense<0.000000e+00> : vector<16x256xf32>
    %7 = tpu.matmul %5, %6, %cst {dimension_numbers = #tpu.dot_dimension_numbers<[1], [0], [0], [1], [0, 0, 1, 1], [], []>} : vector<16x256xbf16>, vector<256x256xbf16>, vector<16x256xf32> -> vector<16x256xf32>
    %8 = arith.addf %3, %7 : vector<16x256xf32>
    %c0_6 = arith.constant 0 : index
    %c0_7 = arith.constant 0 : index
    %9 = vector.load %arg6[%c0_6, %c0_7] : memref<16x256xf32, #tpu.memory_space<vmem>>, vector<16x256xf32>
    tpu.vector_store %arg6[%c0_6, %c0_7], %8 {strides = array<i32>} : memref<16x256xf32, #tpu.memory_space<vmem>>, vector<16x256xf32>,
    return
  }
  func.func @transform_0(%arg0: i32, %arg1: i32, %arg2: i32) -> (i32, i32) {
    %c0_i32 = arith.constant 0 : i32
    return %arg0, %arg2 : i32, i32
  }
  func.func @transform_1(%arg0: i32, %arg1: i32, %arg2: i32) -> (i32, i32) {
    %c0_i32 = arith.constant 0 : i32
    return %arg2, %arg1 : i32, i32
  }
  func.func @transform_2(%arg0: i32, %arg1: i32, %arg2: i32) -> (i32, i32) {
    %c0_i32 = arith.constant 0 : i32
    %c0_i32_0 = arith.constant 0 : i32
    return %c0_i32, %arg1 : i32, i32
  }
  func.func @transform_3(%arg0: i32, %arg1: i32, %arg2: i32) -> (i32, i32) {
    %c0_i32 = arith.constant 0 : i32
    return %arg0, %arg1 : i32, i32
  }
}

</mosaic_0001>

<bundles_post_ra>
// kernel: tpu_custom_call.1
= control target key start
LH: loop header
LB: loop body
LE: loop exit
PB: predicated region body
PF: predicated region fallthrough
CT: control target
= control target key end

     0   :  { %s1611_s0 = inlined_call_operand.hbm [shape: f32[16,512], index: 0, kind: input, shape index: {}]   ;;  %s1612_s1 = inlined_call_operand.hbm [shape: bf16[512,512], index: 1, kind: input, shape index: {}]   ;;  %s1613_s2 = inlined_call_operand.vmem [shape: f32[1,512], index: 2, kind: input, shape index: {}]   ;;  %s1614_s3 = inlined_call_operand.hbm [shape: f32[16,512], index: 3, kind: output, shape index: {}]  }
   0x1   :  { %1626 = sst [smem:[#allocation17_spill]] %s1611_s0 }
   0x2   :  { %1627 = sst [smem:[#allocation18_spill]] %s1614_s3 }
   0x3   :  { %8 = vsyncpa [#allocation3], 0 }
   0x4   :  { %10 = vsyncpa [#allocation3 + $0x1], 0 }
   0x5   :  { %11 = vsyncpa [#allocation6], 0 }
   0x6   :  { %13 = vsyncpa [#allocation6 + $0x1], 0 }
   0x7   :  { %14 = vsyncpa [#allocation4], 0 }
   0x8   :  { %16 = vsyncpa [#allocation4 + $0x1], 0  ;;  %s1191_s12 = smov 0   ;;  %s1193_s13 = smov 0  }
   0x9   :  { %s1195_s14 = smov 0   ;;  %s1197_s15 = smov 0  }
   0xa   :  { %s1199_s16 = smov 0   ;;  %s1201_s17 = smov 0  }
   0xb   :  { %s1203_s18 = smov 0   ;;  %s1205_s19 = smov 0  }
   0xc   :  { %s1207_s20 = smov 0   ;;  %s1209_s21 = smov 0  }
   0xd   :  { %s1211_s22 = smov 0   ;;  %s1213_s23 = smov 0  }
   0xe   :  { %s1215_s24 = smov 0   ;;  %s1217_s25 = smov 0  }
   0xf LB: > { %1628 = sst [smem:[#allocation11_spill]] %s1138_s20  ;;  %s703_s26 = sadd.s32 4294967295, %s1158_s25   ;;  %s1158_s25 = sphi %s1217_s25, %s22_s25   ;;  %s1154_s24 = sphi %s1215_s24, %s1675_s24   ;;  %s1150_s23 = sphi %s1213_s23, %s1674_s23   ;;  %s1146_s22 = sphi %s1211_s22, %s1673_s22   ;;  %s1142_s21 = sphi %s1209_s21, %s1672_s21   ;;  %s1138_s20 = sphi %s1207_s20, %s1661_s20   ;;  %s1134_s19 = sphi %s1205_s19, %s1671_s19   ;;  %s1130_s18 = sphi %s1203_s18, %s1670_s18   ;;  %s1126_s17 = sphi %s1201_s17, %s1669_s17   ;;  %s1122_s16 = sphi %s1199_s16, %s1668_s16   ;;  %s1118_s15 = sphi %s1197_s15, %s1667_s15   ;;  %s1114_s14 = sphi %s1195_s14, %s1666_s14   ;;  %s1110_s13 = sphi %s1193_s13, %s1665_s13   ;;  %s1106_s12 = sphi %s1191_s12, %s1664_s12  }
  0x10   : > { %1629 = sst [smem:[#allocation12_spill]] %s1142_s21  ;;  %s34_s27 = sadd.s32 1, %s1150_s23 }
  0x11   : > { %p1261_p0 = scmp.ge.s32.totalorder %s34_s27, 2  ;;  %s50_s29 = sadd.s32 1, %s1138_s20 }
  0x12   : > { %p57_p1 = scmp.ne.s32.totalorder %s1138_s20, %s1134_s19  ;;  %p1618_p2 = scmp.eq.s32.totalorder %s1158_s25, 0 }
  0x13   : > { %s1677_s27 = smov (%p1261_p0, %s34_s27), 0  ;;  %p63_p4 = scmp.ne.s32.totalorder %s1134_s19, %s1130_s18 }
  0x14   : > { %1631 = sst [smem:[#allocation13_spill]] %s1677_s27  ;;  %p1275_p3 = por %p1618_p2, %p57_p1 }
  0x15   : > { %s1282_s4 = ssub.s32 %s1150_s23, %s1677_s27  ;;  %p1284_p5 = scmp.eq.s32.totalorder %s703_s26, 0 }
  0x16   : > { %p48_p6 = scmp.eq.s32.totalorder %s1282_s4, 0  ;;  %p1289_p7 = scmp.eq.s32.totalorder %s703_s26, 3 }
  0x17   : > { %s1633_s5 = scalar_select %p1284_p5, 1, 0 }
  0x18   : > { %s1634_s6 = scalar_select %p1289_p7, 1, 0 }
  0x19   : > { %p1295_p8 = por %p1284_p5, %p63_p4  ;;  %p1617_p9 = scmp.lt.s32.totalorder %s1158_s25, 4 }
  0x1a   : > { %s1300_s8 = scalar_select %p48_p6, %s1138_s20, %s50_s29  }
  0x1b   : > { %s1635_s7 = scalar_select %p1295_p8, 1, 0 }
  0x1c   : > { %1636 = sst [smem:[#allocation14_spill]] %s1300_s8  ;;  %s169_s9 = sand.u32 1, %s1138_s20  }
  0x1d   : > { %s707_s10 = sshll.u32 %s169_s9, 5  ;;  %s758_s11 = sshll.u32 %s1150_s23, 8 }
  0x1e   : > { %s1637_s0 = sld [smem:[#allocation17_spill]]  ;;  %s173_s26 = scalar_lea.vmem [#allocation2], %s707_s10 }
  0x1f   : > { %s183_s21 = sshll.u32 %s173_s26, 4  ;;  %p1316_p10 = pnand %p1617_p9, %p1275_p3  ;;  %s1310_s21 = int_to_ptr.vmem [resolvable:$true] %s183_s21 }
  0x20   : > { %s1320_s8 = scalar_lea.sflag [#allocation3], %s169_s9 }
  0x21   : > { %p950_p12 = pneg %p1316_p10 }
  0x24   : > { %s1308_s3 = scalar_lea.hbm %s1637_s0, %s758_s11  ;;  %s953_s30 = scalar_lea.hbm %s1637_s0, 1024 }
  0x25   : > { %s948_s27 = scalar_lea.hbm %s1308_s3, 512  ;;  %p954_p3 = scmp.lt.u32.totalorder %s1308_s3, %s1637_s0 }
  0x26   : > { %p949_p11 = scmp.ne.s32.totalorder %s1308_s3, %s948_s27  ;;  %p955_p4 = scmp.lt.u32.totalorder %s953_s30, %s948_s27 }
  0x27   : > { %p957_p9 = scmp.lt.u32.totalorder %s948_s27, %s1308_s3 }
  0x28   : > { %p951_p13 = pnand %p950_p12, %p949_p11  ;;  %p956_p6 = por %p955_p4, %p954_p3 }
  0x2a   : > { %p952_p1 = pneg %p951_p13  ;;  %p958_p2 = por %p957_p9, %p956_p6 }
  0x2c   : > { %p959_p8 = pnand %p958_p2, %p952_p1 }
  0x2e   : > { %962 = shalt.err (!%p959_p8)
}
  0x2f   : > { %s963_s9 = scalar_lea.vmem %s1310_s21, 512  ;;  %s1160_s10 = smov [#allocation2]  }
  0x30   : > { %p964_p11 = scmp.ne.s32.totalorder %s1310_s21, %s963_s9  ;;  %s968_s11 = sshll.u32 %s1160_s10, 4  ;;  %s969_s11 = int_to_ptr.vmem [resolvable:$false] %s968_s11 }
  0x31   : > { %s970_s18 = scalar_lea.vmem %s969_s11, 1024  ;;  %p971_p5 = scmp.lt.s32.totalorder %s1310_s21, %s969_s11 }
  0x32   : > { %p966_p13 = pnand %p964_p11, %p950_p12  ;;  %p972_p3 = scmp.lt.s32.totalorder %s970_s18, %s963_s9 }
  0x34   : > { %p967_p7 = pneg %p966_p13  ;;  %p973_p4 = por %p972_p3, %p971_p5 }
  0x36   : > { %p974_p9 = pnand %p973_p4, %p967_p7 }
  0x38   : > { %977 = shalt.err (!%p974_p9)
}
  0x39   : > { %s1161_s27 = smov 512   ;;  %s1621_s30 = smov 256  }
  0x3a   : > { %s1163_s26 = smov 16   ;;  %p715_p2 = scmp.ge.s32.totalorder %s1158_s25, 1 }
  0x3b   : > { %770 = dma.hbm_to_vmem [thread:$0]  (!%p1316_p10), %s1308_s3, 512, %s1310_s21, %s1320_s8, %s1161_s27, %s1621_s30, %s1163_s26  }
  0x3c   : > { %p223_p5 = scmp.lt.s32.totalorder %s1158_s25, 5  ;;  %s704_s10 = sadd.s32 4294967294, %s1158_s25  }
  0x3d   : > { %s37_s11 = sadd.s32 1, %s1154_s24  ;;  %s78_s18 = sadd.s32 1, %s1126_s17 }
  0x3e   : > { %p1351_p7 = pnand %p715_p2, %p223_p5  ;;  %s1679_s11 = smov (!%p1261_p0, %s37_s11), %s1154_s24 }
  0x3f   : > { %p85_p8 = scmp.ne.s32.totalorder %s1126_s17, %s1122_s16  ;;  %p91_p10 = scmp.ne.s32.totalorder %s1122_s16, %s1118_s15 }
  0x40   : > { %p39_p12 = scmp.ge.s32.totalorder %s1679_s11, 2  ;;  %s132_s3 = sadd.s32 1, %s1114_s14 }
  0x41   : > { %p1640_p1 = scmp.eq.s32.totalorder %s1158_s25, 0  ;;  %p1642_p11 = scmp.ne.s32.totalorder %s1633_s5, 0 }
  0x42   : > { %s1681_s11 = smov (%p39_p12, %s1679_s11), 0  ;;  %p142_p0 = scmp.ne.s32.totalorder %s1114_s14, %s1110_s13 }
  0x43   : > { %p1368_p6 = por %p85_p8, %p1640_p1  ;;  %p1374_p13 = por %p91_p10, %p1642_p11 }
  0x44   : > { %1644 = sst [smem:[#allocation15_spill]] %s1681_s11  ;;  %p148_p3 = scmp.ne.s32.totalorder %s1110_s13, %s1106_s12 }
  0x45   : > { %s1643_s8 = scalar_select %p1374_p13, 1, 0 }
  0x46   : > { %s74_s15 = ssub.s32 %s1154_s24, %s1681_s11  ;;  %p149_p4 = scmp.eq.s32.totalorder %s704_s10, 3 }
  0x47   : > { %s75_s28 = sor.u32 %s74_s15, %s1282_s4  ;;  %p130_p9 = scmp.eq.s32.totalorder %s74_s15, 0 }
  0x48   : > { %p76_p2 = scmp.eq.s32.totalorder %s75_s28, 0  ;;  %p1645_p5 = scmp.ne.s32.totalorder %s1634_s6, 0 }
  0x49   : > { %s1394_s29 = scalar_select %p130_p9, %s1114_s14, %s132_s3  }
  0x4a   : > { %p1389_p8 = por %p1645_p5, %p142_p0  ;;  %p1399_p10 = por %p149_p4, %p148_p3 }
  0x4b   : > { %s1397_s27 = scalar_select %p76_p2, %s1126_s17, %s78_s18  }
  0x4c   : > { %s1646_s5 = scalar_select %p1389_p8, 1, 0 }
  0x4d   : > { %1647 = sst [smem:[#allocation16_spill]] %s1397_s27  ;;  %s193_s30 = sand.u32 1, %s1126_s17  }
  0x4e   : > { %s1648_s26 = scalar_select %p1399_p10, 1, 0 }
  0x4f   : > { %s710_s10 = sshll.u32 %s193_s30, 8  ;;  %s712_s4 = sshll.u32 %s1154_s24, 1 }
  0x50   : > { %s759_s0 = sshll.u32 %s1150_s23, 7  ;;  %s197_s11 = scalar_lea.vmem [#allocation5], %s710_s10 }
  0x51   : > { %s207_s15 = sshll.u32 %s197_s11, 4  ;;  %s204_s28 = sadd.s32 %s759_s0, %s712_s4  ;;  %s1406_s15 = int_to_ptr.vmem [resolvable:$true] %s207_s15 }
  0x52   : > { %s714_s6 = sshll.u32 %s204_s28, 6  ;;  %p1649_p12 = scmp.lt.s32.totalorder %s1158_s25, 4 }
  0x53   : > { %s1419_s27 = scalar_lea.hbm %s1612_s1, %s714_s6  ;;  %s1421_s0 = scalar_lea.sflag [#allocation6], %s193_s30 }
  0x54   : > { %p1412_p1 = pnand %p1649_p12, %p1368_p6  ;;  %s978_s11 = scalar_lea.hbm %s1419_s27, 4096 }
  0x55   : > { %p979_p11 = scmp.ne.s32.totalorder %s1419_s27, %s978_s11  ;;  %s983_s10 = scalar_lea.hbm %s1612_s1, 16384 }
  0x56   : > { %p980_p6 = pneg %p1412_p1  ;;  %p984_p4 = scmp.lt.u32.totalorder %s1419_s27, %s1612_s1 }
  0x57   : > { %p985_p9 = scmp.lt.u32.totalorder %s983_s10, %s978_s11  ;;  %p987_p5 = scmp.lt.u32.totalorder %s978_s11, %s1419_s27 }
  0x58   : > { %p981_p0 = pnand %p980_p6, %p979_p11 }
  0x59   : > { %p986_p2 = por %p985_p9, %p984_p4 }
  0x5a   : > { %p982_p3 = pneg %p981_p0 }
  0x5b   : > { %p988_p12 = por %p987_p5, %p986_p2 }
  0x5d   : > { %p989_p10 = pnand %p988_p12, %p982_p3 }
  0x5f   : > { %992 = shalt.err (!%p989_p10)
}
  0x60   : > { %s993_s30 = scalar_lea.vmem %s1406_s15, 4096  ;;  %s1164_s6 = smov [#allocation5]  }
  0x61   : > { %p994_p11 = scmp.ne.s32.totalorder %s1406_s15, %s993_s30  ;;  %s998_s18 = sshll.u32 %s1164_s6, 4  ;;  %s999_s18 = int_to_ptr.vmem [resolvable:$false] %s998_s18 }
  0x62   : > { %s1000_s21 = scalar_lea.vmem %s999_s18, 8192  ;;  %p1001_p13 = scmp.lt.s32.totalorder %s1406_s15, %s999_s18 }
  0x63   : > { %p996_p0 = pnand %p994_p11, %p980_p6  ;;  %p1002_p4 = scmp.lt.s32.totalorder %s1000_s21, %s993_s30 }
  0x65   : > { %p997_p8 = pneg %p996_p0  ;;  %p1003_p9 = por %p1002_p4, %p1001_p13 }
  0x67   : > { %p1004_p2 = pnand %p1003_p9, %p997_p8 }
  0x69   : > { %1007 = shalt.err (!%p1004_p2)
}
  0x6a   : > { %s1165_s11 = smov 128   ;;  %s1166_s20 = smov 8  }
  0x6b   : > { %s1651_s10 = smov 256   ;;  %227 = sbr.rel (%p1351_p7) target bundleno = 436 (0x1b4), region = 32 }
  0x6c   : > { %773 = dma.hbm_to_vmem [thread:$0]  (!%p1412_p1), %s1419_s27, 4096, %s1406_s15, %s1421_s0, %s1651_s10, %s1165_s11, %s1166_s20  }
  0x6d   : > { %s229_s4 = sand.u32 (!%p1351_p7), 1, %s1134_s19   ;;  %p1652_p13 = scmp.ne.s32.totalorder (!%p1351_p7), %s1635_s7, 0 }
  0x6e   : > { %s716_s28 = sshll.u32 (!%p1351_p7), %s229_s4, 5  ;;  %s230_s30 = scalar_lea.sflag (!%p1351_p7), [#allocation3], %s229_s4 }
  0x6f   : > { %s1453_s6 = scalar_lea.vmem (!%p1351_p7), [#allocation2], %s716_s28 }
  0x72   : > { %1093 = dma.done.wait (%p1652_p13), %s230_s30, 512  }
  0x73   : > { %1095 = vsyncadd (%p1652_p13), %s230_s30, 4294966784  ;;  %s238_s3 = sand.u32 1, %s1122_s16   ;;  %p1653_p7 = scmp.ne.s32.totalorder %s1643_s8, 0 }
  0x74   : > { %s717_s18 = sshll.u32 %s238_s3, 8  ;;  %s239_s27 = scalar_lea.sflag [#allocation6], %s238_s3 }
  0x75   : > { %s1460_s15 = scalar_lea.vmem [#allocation5], %s717_s18 }
  0x76   : > { %1097 = dma.done.wait (%p1653_p7), %s239_s27, 4096  }
  0x77   : > { %1099 = vsyncadd (%p1653_p7), %s239_s27, 4294963200  ;;  %s271_s9 = sand.u32 1, %s1110_s13   ;;  %s719_s0 = sshll.u32 %s1146_s22, 1 }
  0x78   : > { %s718_s7 = sshll.u32 %s271_s9, 5  ;;  %p279_p8 = scmp.lt.s32.totalorder %s719_s0, 3 }
  0x79   : > { %s1473_s10 = scalar_lea.vmem [#allocation7], %s718_s7  ;;  %s1654_s4 = sld [smem:[#allocation12_spill]] }
  0x7a   : > { %s1683_s0 = smov (!%p279_p8, %s719_s0), 3 }
  0x7b   : > { %s281_s20 = scalar_lea.vmem %s1613_s2, %s1683_s0 }
  0x7f   : > { %p720_p10 = scmp.ne.s32.totalorder %s1654_s4, 0 }
  0x80   : > { %v291_v0 = vlaneseq (!%p720_p10)  ;;  %v289_v2 = vld [vmem:[%s281_s20] sm:$0x3] (!%p720_p10) }
  0x81   : > { %288 = sbr.rel (%p720_p10) target bundleno = 138 (0x8a), region = 44 }
  0x82   : > { %v292_v1 = vshrl.u32 (!%p720_p10), %v291_v0, 7 }
  0x84   : > { %v293_v3 = vsub.s32 (!%p720_p10), 0, %v292_v1  ;;  %v297_v4 = vsub.s32 (!%p720_p10), 1, %v292_v1 }
  0x86   : > { %v294_v5 = vrot.slane (!%p720_p10), %v289_v2, %v293_v3  ;;  %v298_v6 = vrot.slane (!%p720_p10), %v289_v2, %v297_v4 }
  0x88   : > { %301 = vst [vmem:[%s1473_s10] sm:$0xff] %v294_v5  ;;  %303 = vst [vmem:[%s1473_s10 + $0x10] sm:$0xff] %v294_v5 }
  0x89   : > { %302 = vst [vmem:[%s1473_s10 + $0x8] sm:$0xff] %v298_v6  ;;  %304 = vst [vmem:[%s1473_s10 + $0x18] sm:$0xff] %v298_v6 }
  0x8a PF: > { %v900_v7 = vld [vmem:[%s1460_s15 + $0x4] ss:$8 sps:$4 sm:$0xff]   ;;  %v902_v8 = vld [vmem:[%s1460_s15] ss:$8 sps:$4 sm:$0xff]   ;;  %v903_v9 = vld [vmem:[%s1460_s15 + $0x14] ss:$8 sps:$4 sm:$0xff]  }
  0x8b   : > { %507 = vmatprep.subr.bf16.mxu0 %v900_v7  ;;  %v905_v10 = vld [vmem:[%s1460_s15 + $0x10] ss:$8 sps:$4 sm:$0xff]   ;;  %v906_v11 = vld [vmem:[%s1460_s15 + $0x24] ss:$8 sps:$4 sm:$0xff]   ;;  %v908_v12 = vld [vmem:[%s1460_s15 + $0x20] ss:$8 sps:$4 sm:$0xff]  }
  0x8c   : > { %508 = vmatpush1.bf16.msra.mxu0 %v902_v8  ;;  %v909_v13 = vld [vmem:[%s1460_s15 + $0x34] ss:$8 sps:$4 sm:$0xff]   ;;  %v911_v14 = vld [vmem:[%s1460_s15 + $0x30] ss:$8 sps:$4 sm:$0xff]   ;;  %v912_v15 = vld [vmem:[%s1460_s15 + $0x44] ss:$8 sps:$4 sm:$0xff]  }
  0x8d   : > { %509 = vmatprep.subr.bf16.mxu0 %v903_v9  ;;  %v914_v16 = vld [vmem:[%s1460_s15 + $0x40] ss:$8 sps:$4 sm:$0xff]   ;;  %v915_v17 = vld [vmem:[%s1460_s15 + $0x54] ss:$8 sps:$4 sm:$0xff]   ;;  %v917_v18 = vld [vmem:[%s1460_s15 + $0x50] ss:$8 sps:$4 sm:$0xff]  }
  0x8e   : > { %v918_v19 = vld [vmem:[%s1460_s15 + $0x64] ss:$8 sps:$4 sm:$0xff]   ;;  %v312_v21 = vld [vmem:[%s1453_s6 + $0x18] sm:$0xff]  ;;  %v920_v23 = vld [vmem:[%s1460_s15 + $0x60] ss:$8 sps:$4 sm:$0xff]   ;;  %s760_s8 = sshll.u32 %s1146_s22, 8 }
  0x8f   : > { %v310_v20 = vld [vmem:[%s1453_s6 + $0x8] sm:$0xff]  ;;  %v921_v24 = vld [vmem:[%s1460_s15 + $0x74] ss:$8 sps:$4 sm:$0xff]   ;;  %v923_v25 = vld [vmem:[%s1460_s15 + $0x70] ss:$8 sps:$4 sm:$0xff]   ;;  %s575_s28 = sshll.u32 %s1473_s10, 4  ;;  %s1528_s28 = int_to_ptr.vmem [resolvable:$true] %s575_s28 }
  0x90   : > { %510 = vmatpush1.bf16.msra.mxu0 %v905_v10  ;;  %v314_v22 = vpack.c.bf16 %v312_v21, %v310_v20  ;;  %v924_v26 = vld [vmem:[%s1460_s15 + $0x84] ss:$8 sps:$4 sm:$0xff]   ;;  %v926_v27 = vld [vmem:[%s1460_s15 + $0x80] ss:$8 sps:$4 sm:$0xff]   ;;  %v927_v28 = vld [vmem:[%s1460_s15 + $0x94] ss:$8 sps:$4 sm:$0xff]  }
  0x91   : > { %511 = vmatprep.subr.bf16.mxu0 %v906_v11  ;;  %v929_v29 = vld [vmem:[%s1460_s15 + $0x90] ss:$8 sps:$4 sm:$0xff]   ;;  %v930_v30 = vld [vmem:[%s1460_s15 + $0xa4] ss:$8 sps:$4 sm:$0xff]   ;;  %v932_v31 = vld [vmem:[%s1460_s15 + $0xa0] ss:$8 sps:$4 sm:$0xff]  }
  0x92   : > { %539 = vmatprep.mubr.bf16.mxu0 %v314_v22  ;;  %v933_v32 = vld [vmem:[%s1460_s15 + $0xb4] ss:$8 sps:$4 sm:$0xff]   ;;  %v935_v33 = vld [vmem:[%s1460_s15 + $0xb0] ss:$8 sps:$4 sm:$0xff]   ;;  %v936_v34 = vld [vmem:[%s1460_s15 + $0xc4] ss:$8 sps:$4 sm:$0xff]  }
  0x93   : > { %v938_v35 = vld [vmem:[%s1460_s15 + $0xc0] ss:$8 sps:$4 sm:$0xff]   ;;  %v939_v36 = vld [vmem:[%s1460_s15 + $0xd4] ss:$8 sps:$4 sm:$0xff]   ;;  %v941_v37 = vld [vmem:[%s1460_s15 + $0xd0] ss:$8 sps:$4 sm:$0xff]  }
  0x94   : > { %512 = vmatpush1.bf16.msra.mxu0 %v908_v12  ;;  %v942_v38 = vld [vmem:[%s1460_s15 + $0xe4] ss:$8 sps:$4 sm:$0xff]   ;;  %v944_v39 = vld [vmem:[%s1460_s15 + $0xe0] ss:$8 sps:$4 sm:$0xff]   ;;  %v945_v40 = vld [vmem:[%s1460_s15 + $0xf4] ss:$8 sps:$4 sm:$0xff]  }
  0x95   : > { %513 = vmatprep.subr.bf16.mxu0 %v909_v13  ;;  %v947_v41 = vld [vmem:[%s1460_s15 + $0xf0] ss:$8 sps:$4 sm:$0xff]   ;;  %v309_v42 = vld [vmem:[%s1453_s6] sm:$0xff]  ;;  %v306_v46 = vld [vmem:[%s1473_s10 + $0x8] sm:$0xff]  ;;  %s1655_s3 = sld [smem:[#allocation18_spill]]  ;;  %s1535_s22 = scalar_lea.sflag [#allocation4], %s271_s9 }
  0x96   : > { %v311_v43 = vld [vmem:[%s1453_s6 + $0x10] sm:$0xff]  ;;  %v305_v45 = vld [vmem:[%s1473_s10] sm:$0xff]  ;;  %v308_v51 = vld [vmem:[%s1473_s10 + $0x18] sm:$0xff]  ;;  %s1008_s27 = scalar_lea.vmem %s1528_s28, 512  ;;  %p1656_p6 = scmp.ne.s32.totalorder %s1646_s5, 0 }
  0x97   : > { %v313_v44 = vpack.c.bf16 %v311_v43, %v309_v42  ;;  %v307_v48 = vld [vmem:[%s1473_s10 + $0x10] sm:$0xff]  ;;  %p1009_p1 = scmp.ne.s32.totalorder %s1528_s28, %s1008_s27  ;;  %s1167_s15 = smov [#allocation7]  }
  0x98   : > { %514 = vmatpush1.bf16.msra.mxu0 %v911_v14  ;;  %s1012_s0 = sshll.u32 %s1167_s15, 4  ;;  %s1013_s0 = int_to_ptr.vmem [resolvable:$false] %s1012_s0 }
  0x99   : > { %515 = vmatprep.subr.bf16.mxu0 %v912_v15  ;;  %p1010_p3 = pnand %p1009_p1, %p1656_p6  ;;  %s1014_s7 = scalar_lea.vmem %s1013_s0, 1024 }
  0x9a   : > { %p1015_p12 = scmp.lt.s32.totalorder %s1528_s28, %s1013_s0  ;;  %p1016_p11 = scmp.lt.s32.totalorder %s1014_s7, %s1008_s27 }
  0x9b   : > { %s1525_s18 = scalar_lea.hbm %s1655_s3, %s760_s8  ;;  %p1011_p5 = pneg %p1010_p3 }
  0x9c   : > { %516 = vmatpush1.bf16.msra.mxu0 %v914_v16  ;;  %p1017_p0 = por %p1016_p11, %p1015_p12 }
  0x9d   : > { %517 = vmatprep.subr.bf16.mxu0 %v915_v17 }
  0x9e   : > { %p1018_p4 = pnand %p1017_p0, %p1011_p5 }
  0xa0   : > { %518 = vmatpush1.bf16.msra.mxu0 %v917_v18 }
  0xa1   : > { %519 = vmatprep.subr.bf16.mxu0 %v918_v19 }
  0xa4   : > { %520 = vmatpush1.bf16.msra.mxu0 %v920_v23 }
  0xa5   : > { %521 = vmatprep.subr.bf16.mxu0 %v921_v24 }
  0xa8   : > { %522 = vmatpush1.bf16.msra.mxu0 %v923_v25 }
  0xa9   : > { %523 = vmatprep.subr.bf16.mxu0 %v924_v26 }
  0xac   : > { %524 = vmatpush1.bf16.msra.mxu0 %v926_v27 }
  0xad   : > { %525 = vmatprep.subr.bf16.mxu0 %v927_v28 }
  0xb0   : > { %526 = vmatpush1.bf16.msra.mxu0 %v929_v29 }
  0xb1   : > { %527 = vmatprep.subr.bf16.mxu0 %v930_v30 }
  0xb4   : > { %528 = vmatpush1.bf16.msra.mxu0 %v932_v31 }
  0xb5   : > { %529 = vmatprep.subr.bf16.mxu0 %v933_v32 }
  0xb8   : > { %530 = vmatpush1.bf16.msra.mxu0 %v935_v33 }
  0xb9   : > { %531 = vmatprep.subr.bf16.mxu0 %v936_v34 }
  0xbc   : > { %532 = vmatpush1.bf16.msra.mxu0 %v938_v35 }
  0xbd   : > { %533 = vmatprep.subr.bf16.mxu0 %v939_v36 }
  0xc0   : > { %534 = vmatpush1.bf16.msra.mxu0 %v941_v37 }
  0xc1   : > { %535 = vmatprep.subr.bf16.mxu0 %v942_v38 }
  0xc4   : > { %536 = vmatpush1.bf16.msra.mxu0 %v944_v39 }
  0xc5   : > { %537 = vmatprep.subr.bf16.mxu0 %v945_v40 }
  0xc8   : > { %538 = vmatpush1.bf16.msra.mxu0 %v947_v41 }
  0xcb   : > { %540 = vmatmul.mubr.bf16.vlgmr.msra.gmra.mrb[0].mxu0 %v313_v44 }
 0x19e   : > { %v541_v47 = vpop.f32.mrb[0].mxu0 }
 0x19f   : > { %v550_v49 = vadd.f32 %v541_v47, %v305_v45  ;;  %v543_v50 = vpop.f32.mrb[1].mxu0 }
 0x1a0   : > { %v551_v52 = vadd.f32 %v543_v50, %v306_v46  ;;  %v545_v53 = vpop.f32.mrb[2].mxu0 }
 0x1a1   : > { %554 = vst [vmem:[%s1473_s10] sm:$0xff] %v550_v49  ;;  %v552_v54 = vadd.f32 %v545_v53, %v307_v48  ;;  %v547_v55 = vpop.f32.mrb[3].mxu0 }
 0x1a2   : > { %555 = vst [vmem:[%s1473_s10 + $0x8] sm:$0xff] %v551_v52  ;;  %v553_v56 = vadd.f32 %v547_v55, %v308_v51 }
 0x1a3   : > { %556 = vst [vmem:[%s1473_s10 + $0x10] sm:$0xff] %v552_v54 }
 0x1a4   : > { %557 = vst [vmem:[%s1473_s10 + $0x18] sm:$0xff] %v553_v56 }
 0x1a5   : > { %1021 = shalt.err (!%p1018_p4)
}
 0x1a6   : > { %s1022_s9 = scalar_lea.hbm %s1525_s18, 512  ;;  %s1026_s20 = scalar_lea.hbm %s1655_s3, 1024 }
 0x1a7   : > { %p1023_p9 = scmp.ne.s32.totalorder %s1525_s18, %s1022_s9  ;;  %p1027_p7 = scmp.lt.u32.totalorder %s1525_s18, %s1655_s3 }
 0x1a8   : > { %p1028_p8 = scmp.lt.u32.totalorder %s1026_s20, %s1022_s9  ;;  %p1030_p1 = scmp.lt.u32.totalorder %s1022_s9, %s1525_s18 }
 0x1a9   : > { %p1024_p2 = pnand %p1023_p9, %p1656_p6 }
 0x1aa   : > { %p1029_p10 = por %p1028_p8, %p1027_p7 }
 0x1ab   : > { %p1025_p13 = pneg %p1024_p2 }
 0x1ac   : > { %p1031_p3 = por %p1030_p1, %p1029_p10 }
 0x1ae   : > { %p1032_p5 = pnand %p1031_p3, %p1025_p13 }
 0x1b0   : > { %1035 = shalt.err (!%p1032_p5)
}
 0x1b1   : > { %s1168_s8 = smov 256   ;;  %s1169_s30 = smov 512  }
 0x1b2   : > { %s1170_s6 = smov 16  }
 0x1b3   : > { %765 = dma.vmem_to_hbm [thread:$0]  (%p1656_p6), %s1528_s28, 512, %s1525_s18, %s1535_s22, %s1168_s8, %s1169_s30, %s1170_s6  }
 0x1b4 PF: > { %p779_p12 = scmp.ge.s32.totalorder %s1158_s25, 2  ;;  %s590_s27 = sand.u32 1, %s1106_s12  }
 0x1b5   : > { %p1657_p11 = scmp.ne.s32.totalorder %s1648_s26, 0  ;;  %s591_s15 = scalar_lea.sflag [#allocation4], %s590_s27 }
 0x1b7   : > { %p775_p0 = pnand %p779_p12, %p1657_p11 }
 0x1b9   : > { %1101 = dma.done.wait (!%p775_p0), %s591_s15, 512  }
 0x1ba   : > { %1103 = vsyncadd (!%p775_p0), %s591_s15, 4294966784  ;;  %s22_s25 = sadd.s32 1, %s1158_s25   ;;  %s1659_s5 = sld [smem:[#allocation16_spill]] }
 0x1bb   : > { %p1564_p4 = scmp.ge.s32.totalorder %s22_s25, 6   ;;  %s1660_s28 = sld [smem:[#allocation11_spill]] }
 0x1bc   : > { %s1661_s20 = sld [smem:[#allocation14_spill]]  ;;  %s1662_s26 = sld [smem:[#allocation13_spill]] }
 0x1bd   : > { %s1663_s7 = sld [smem:[#allocation15_spill]]  ;;  %s1664_s12 = smov %s1110_s13 }
 0x1be   : > { %s1665_s13 = smov %s1114_s14  ;;  %s1666_s14 = smov %s1394_s29 }
 0x1bf   : > { %s1667_s15 = smov %s1122_s16  ;;  %s1668_s16 = smov %s1126_s17 }
 0x1c0   : > { %s1669_s17 = smov %s1659_s5  ;;  %s1670_s18 = smov %s1134_s19 }
 0x1c1   : > { %s1671_s19 = smov %s1660_s28  ;;  %s1672_s21 = smov %s1150_s23 }
 0x1c2   : > { %s1673_s22 = smov %s1154_s24  ;;  %s1674_s23 = smov %s1662_s26 }
 0x1c3   : > { %s1675_s24 = smov %s1663_s7  ;;  %21 = sbr.rel (!%p1564_p4) target bundleno = 15 (0xf), region = 97 }
 0x1ca   :  { %596 = vsyncpa [#allocation3], 1 }
 0x1cb   :  { %598 = vsyncpa [#allocation3 + $0x1], 1 }
 0x1cc   :  { %599 = vsyncpa [#allocation6], 1 }
 0x1cd   :  { %601 = vsyncpa [#allocation6 + $0x1], 1 }
 0x1ce   :  { %602 = vsyncpa [#allocation4], 1 }
 0x1cf   :  { %604 = vsyncpa [#allocation4 + $0x1], 1 }

</bundles_post_ra>
